<compile_context>
chip_gen: v7x
topology: tpu7x:2x2x1
jax: 0.10.0
libtpu: 0.0.40
codegen_flags: <defaults>
</compile_context>

<pallas_src>
import functools
import math

import jax
import jax.numpy as jnp
from jax.experimental import pallas as pl
from jax.experimental.pallas import tpu as pltpu

_LANE = 128


def _round_up(x, m):
    return ((x + m - 1) // m) * m


def _vmem_budget_bytes():
    """Generation-aware scoped-VMEM budget."""
    cap = None
    try:
        info = pltpu.get_tpu_info()
        for name in ("vmem_capacity_bytes", "vmem_size_bytes", "vmem_bytes"):
            cap = getattr(info, name, None)
            if cap:
                break
    except Exception:
        cap = None
    if not cap:
        # Unknown chip: stay conservative but well above the old 16/32 MiB defaults.
        return 64 * 1024 * 1024
    if cap <= 64 * 1024 * 1024:
        # v7x-class: 64 MiB of VMEM per TensorCore -> leave headroom.
        return min(48 * 1024 * 1024, (3 * cap) // 4)
    # v5e / v6e: 128 MiB physical VMEM.
    return 96 * 1024 * 1024


def _nb_base(c_in, c_out):
    """Smallest batch block making nb*C_in and nb*C_out multiples of 8 (f32 sublanes)."""
    nb1 = 8 // math.gcd(c_in, 8)
    nb2 = 8 // math.gcd(c_out, 8)
    return (nb1 * nb2) // math.gcd(nb1, nb2)


def _dsconv1d_kernel(x_ref, h_ref, wdw_ref, wpw_ref, b_ref, o_ref, *,
                     K, halo_resident, mxu_dtype):
    # x_ref   : (NBC, LT)           packed input tile (batch*in_channel on sublanes)
    # h_ref   : (n_lt | 1, NBC, KH) right halo: first K-1 input lanes of the next tile
    # wdw_ref : (NBC, K)            depthwise taps, repeated over the batch block (f32)
    # wpw_ref : (NBO, NBC)          block-diagonal pointwise weights (f32)
    # b_ref   : (NBO, 1)            combined bias (depthwise bias folded through)
    # o_ref   : (NBO, LT)           packed output tile (batch*out_channel on sublanes)
    lt = x_ref.shape[1]
    x = x_ref[...].astype(jnp.float32)
    wdw = wdw_ref[...]

    # Depthwise conv (cross-correlation): unrolled tap loop on the VPU.  Each shifted
    # view is built from the resident tile + tiny halo (no (LT+K-1) scratch copy and
    # no per-step halo DMA); the lane shift lowers to XLU rotates/selects.
    acc = x * wdw[:, 0:1]
    if K > 1:
        halo_idx = pl.program_id(1) if halo_resident else 0
        halo = h_ref[halo_idx].astype(jnp.float32)            # (NBC, K-1)
        for k in range(1, K):
            tap = jnp.concatenate([x[:, k:], halo[:, :k]], axis=1)
            acc = acc + tap * wdw[:, k:k + 1]

    # Pointwise 1x1 conv: a single MXU matmul over the packed slab with a
    # block-diagonal weight; combined bias added on the VPU.  Optionally cast the
    # operands to bf16 (MXU-native on v5e/v6e/v7x) while accumulating in f32.
    w = wpw_ref[...]
    if mxu_dtype is not None:
        w = w.astype(mxu_dtype)
        acc = acc.astype(mxu_dtype)
    out = jnp.dot(w, acc, preferred_element_type=jnp.float32) + b_ref[...]
    o_ref[...] = out.astype(o_ref.dtype)


def depthwise_separable_conv1d(x, w_dw, b_dw, w_pw, b_pw, *, padding,
                               l_tile=None, nb=None, mxu_dtype=None):
    """x: (N, C_in, L).  w_dw: (C_in, 1, K), b_dw: (C_in,),
    w_pw: (C_out, C_in, 1), b_pw: (C_out,).  Returns (N, C_out, L_out).

    mxu_dtype: set to jnp.bfloat16 to run the pointwise MXU matmul on bf16 operands
    (faster on all generations, needs a looser tolerance).  Default keeps f32."""
    N, C_in, L = x.shape
    K = w_dw.shape[-1]
    C_out = w_pw.shape[0]
    L_out = L + 2 * padding - K + 1
    kh = max(K - 1, 1)

    budget = _vmem_budget_bytes()
    nb_align = _nb_base(C_in, C_out)

    # --- length tiling: lane-dense tiles sized from the VMEM budget ---
    if l_tile is None:
        # ~1/3 of the scoped budget for the per-step working set (double-buffered
        # x + out blocks plus f32 temporaries), capped at 8K lanes.
        per_lane = 4 * (5 * nb_align * C_in + 3 * nb_align * C_out)
        l_tile = max(_LANE, min(8192, (budget // 3) // per_lane))
    tile = min(_round_up(l_tile, _LANE), _round_up(L_out, _LANE))
    n_lt = pl.cdiv(L_out, tile)
    lp_total = n_lt * tile

    # --- batch blocking: grow nb (in multiples of the sublane-alignment base) to fill
    #     the per-step budget, keeping >=2 grid blocks when possible (two v7x TCs). ---
    if nb is None:
        nb = nb_align
        per_row = 4 * (5 * C_in + 3 * C_out) * tile
        while True:
            cand = nb * 2
            if cand > _round_up(N, nb_align):
                break
            if cand * per_row > budget // 3:
                break
            if (pl.cdiv(N, cand) * n_lt < 2) and (pl.cdiv(N, nb) * n_lt >= 2):
                break
            nb = cand
    else:
        nb = _round_up(nb, nb_align)
    n_pad = _round_up(N, nb)
    nbc, nbo = nb * C_in, nb * C_out

    # Conv zero-padding, lane-alignment padding and the trailing (K-1) halo lanes are
    # fused into ONE jnp.pad.
    lp_in = lp_total + kh
    xp = jnp.pad(x, ((0, n_pad - N), (0, 0), (padding, lp_in - L - padding)))

    # Right halo for every length tile: halo[t] = xp[:, :, (t+1)*tile : (t+1)*tile+K-1].
    if K > 1:
        l_idx = (jnp.arange(n_lt)[:, None] + 1) * tile + jnp.arange(K - 1)[None, :]
        halo = jnp.transpose(xp[:, :, l_idx], (2, 0, 1, 3))    # (n_lt, n_pad, C_in, K-1)
        halo = halo.reshape(n_lt, n_pad * C_in, K - 1)
    else:
        halo = jnp.zeros((n_lt, n_pad * C_in, kh), xp.dtype)

    # Pack batch*channel onto the sublane axis (cheap leading-dim reshape in HBM).
    xp = xp.reshape(n_pad * C_in, lp_in)

    # Parameters: fold the depthwise bias through the pointwise weights
    # (Wpw @ (dw + b_dw) + b_pw == Wpw @ dw + (Wpw @ b_dw + b_pw)); tile the depthwise
    # taps over the batch block and build the block-diagonal pointwise weights.
    wdw2 = w_dw.reshape(C_in, K).astype(jnp.float32)
    wpw2 = w_pw.reshape(C_out, C_in).astype(jnp.float32)
    b_comb = (wpw2 @ b_dw.reshape(C_in, 1).astype(jnp.float32)
              + b_pw.reshape(C_out, 1).astype(jnp.float32))
    wdw_tiled = jnp.tile(wdw2, (nb, 1))                         # (NBC, K)
    wpw_blk = jnp.kron(jnp.eye(nb, dtype=jnp.float32), wpw2)    # (NBO, NBC) block-diag
    b_tiled = jnp.tile(b_comb, (nb, 1))                         # (NBO, 1)

    # Keep the halo resident across length tiles (one DMA per batch block) unless the
    # resident slab would eat too much VMEM; then fall back to per-step halo blocks.
    halo_resident = 2 * n_lt * nbc * _LANE * 4 <= budget // 8
    if halo_resident:
        halo_spec = pl.BlockSpec((n_lt, nbc, kh), lambda n, l: (0, n, 0))
    else:
        halo_spec = pl.BlockSpec((1, nbc, kh), lambda n, l: (l, n, 0))

    kernel = functools.partial(_dsconv1d_kernel, K=K,
                               halo_resident=halo_resident, mxu_dtype=mxu_dtype)

    out = pl.pallas_call(
        kernel,
        out_shape=jax.ShapeDtypeStruct((n_pad * C_out, lp_total), x.dtype),
        grid_spec=pltpu.PrefetchScalarGridSpec(
            num_scalar_prefetch=0,
            grid=(n_pad // nb, n_lt),
            in_specs=[
                pl.BlockSpec((nbc, tile), lambda n, l: (n, l)),     # packed input
                halo_spec,                                          # right halo
                pl.BlockSpec((nbc, K), lambda n, l: (0, 0)),        # depthwise taps
                pl.BlockSpec((nbo, nbc), lambda n, l: (0, 0)),      # block-diag pointwise
                pl.BlockSpec((nbo, 1), lambda n, l: (0, 0)),        # combined bias
            ],
            out_specs=pl.BlockSpec((nbo, tile), lambda n, l: (n, l)),
        ),
        compiler_params=pltpu.CompilerParams(
            dimension_semantics=("parallel", "parallel"),
            vmem_limit_bytes=budget,
        ),
    )(xp, halo, wdw_tiled, wpw_blk, b_tiled)

    return out.reshape(n_pad, C_out, lp_total)[:N, :, :L_out]


def _reference(x, w_dw, b_dw, w_pw, b_pw, padding):
    # Pure-JAX reference replicating PyTorch Conv1d (cross-correlation) semantics.
    N, C_in, L = x.shape
    K = w_dw.shape[-1]
    xp = jnp.pad(x, ((0, 0), (0, 0), (padding, padding)))
    L_out = xp.shape[-1] - K + 1
    dw = sum(xp[:, :, k:k + L_out] * w_dw[None, :, 0, k, None] for k in range(K))
    dw = dw + b_dw[None, :, None]
    pw = jnp.einsum('oc,ncl->nol', w_pw[:, :, 0], dw) + b_pw[None, :, None]
    return pw


if __name__ == "__main__":
    # Small shapes consistent with the module: batch=2, in_channels=4,
    # out_channels=8, length=16, kernel_size=3, padding=1.
    N, C_in, C_out, L, K, P = 2, 4, 8, 16, 3, 1

    key = jax.random.PRNGKey(0)
    kx, k1, k2, k3, k4 = jax.random.split(key, 5)
    x = jax.random.normal(kx, (N, C_in, L), dtype=jnp.float32)
    w_dw = jax.random.normal(k1, (C_in, 1, K), dtype=jnp.float32) * 0.5
    b_dw = jax.random.normal(k2, (C_in,), dtype=jnp.float32) * 0.1
    w_pw = jax.random.normal(k3, (C_out, C_in, 1), dtype=jnp.float32) * 0.5
    b_pw = jax.random.normal(k4, (C_out,), dtype=jnp.float32) * 0.1

    out = depthwise_separable_conv1d(x, w_dw, b_dw, w_pw, b_pw, padding=P)
    out = jax.block_until_ready(out)

    ref = _reference(x, w_dw, b_dw, w_pw, b_pw, P)
    assert out.shape == (N, C_out, L + 2 * P - K + 1)
    assert jnp.allclose(out, ref, atol=1e-4, rtol=1e-4), "mismatch vs reference"

    print("KERNEL_OK")
</pallas_src>

<mosaic_0001>
module attributes {stable_mosaic.version = 11 : i64} {
  func.func @_dsconv1d_kernel(%arg0: i32, %arg1: i32, %arg2: memref<8x128xf32, #tpu.memory_space<vmem>>, %arg3: memref<1x8x2xf32, #tpu.memory_space<vmem>>, %arg4: memref<8x3xf32, #tpu.memory_space<vmem>>, %arg5: memref<16x8xf32, #tpu.memory_space<vmem>>, %arg6: memref<16x1xf32, #tpu.memory_space<vmem>>, %arg7: memref<16x128xf32, #tpu.memory_space<vmem>>) attributes {dimension_semantics = [#tpu.dimension_semantics<parallel>, #tpu.dimension_semantics<parallel>], iteration_bounds = array<i64: 1, 1>, scalar_prefetch = 0 : i64, scratch_operands = 0 : i64, tpu.core_type = #tpu.core_type<tc>, window_params = [{transform_indices = @transform_0, window_bounds = array<i64: 8, 128>}, {transform_indices = @transform_1, window_bounds = array<i64: 1, 8, 2>}, {pipeline_mode = #tpu.pipeline_mode<synchronous>, transform_indices = @transform_2, window_bounds = array<i64: 8, 3>}, {pipeline_mode = #tpu.pipeline_mode<synchronous>, transform_indices = @transform_3, window_bounds = array<i64: 16, 8>}, {pipeline_mode = #tpu.pipeline_mode<synchronous>, transform_indices = @transform_4, window_bounds = array<i64: 16, 1>}, {transform_indices = @transform_5, window_bounds = array<i64: 16, 128>}]} {
    %c0 = arith.constant 0 : index
    %c0_0 = arith.constant 0 : index
    %0 = vector.load %arg2[%c0, %c0_0] : memref<8x128xf32, #tpu.memory_space<vmem>>, vector<8x128xf32>
    %c0_1 = arith.constant 0 : index
    %c0_2 = arith.constant 0 : index
    %1 = vector.load %arg4[%c0_1, %c0_2] : memref<8x3xf32, #tpu.memory_space<vmem>>, vector<8x3xf32>
    %2 = vector.extract_strided_slice %1 {offsets = [0, 0], sizes = [8, 1], strides = [1, 1]} : vector<8x3xf32> to vector<8x1xf32>
    %3 = vector.broadcast %2 : vector<8x1xf32> to vector<8x128xf32>
    %4 = arith.mulf %0, %3 : vector<8x128xf32>
    %5 = arith.index_cast %arg1 : i32 to index
    %c0_3 = arith.constant 0 : index
    %c0_4 = arith.constant 0 : index
    %6 = vector.load %arg3[%5, %c0_3, %c0_4] : memref<1x8x2xf32, #tpu.memory_space<vmem>>, vector<1x8x2xf32>
    %7 = vector.shape_cast %6 : vector<1x8x2xf32> to vector<8x2xf32>
    %8 = vector.extract_strided_slice %0 {offsets = [0, 1], sizes = [8, 127], strides = [1, 1]} : vector<8x128xf32> to vector<8x127xf32>
    %9 = vector.extract_strided_slice %7 {offsets = [0, 0], sizes = [8, 1], strides = [1, 1]} : vector<8x2xf32> to vector<8x1xf32>
    %10 = tpu.concatenate %8, %9 in 1 : vector<8x127xf32>, vector<8x1xf32> -> vector<8x128xf32>
    %11 = vector.extract_strided_slice %1 {offsets = [0, 1], sizes = [8, 1], strides = [1, 1]} : vector<8x3xf32> to vector<8x1xf32>
    %12 = vector.broadcast %11 : vector<8x1xf32> to vector<8x128xf32>
    %13 = arith.mulf %10, %12 : vector<8x128xf32>
    %14 = arith.addf %4, %13 : vector<8x128xf32>
    %15 = vector.extract_strided_slice %0 {offsets = [0, 2], sizes = [8, 126], strides = [1, 1]} : vector<8x128xf32> to vector<8x126xf32>
    %16 = tpu.concatenate %15, %7 in 1 : vector<8x126xf32>, vector<8x2xf32> -> vector<8x128xf32>
    %17 = vector.extract_strided_slice %1 {offsets = [0, 2], sizes = [8, 1], strides = [1, 1]} : vector<8x3xf32> to vector<8x1xf32>
    %18 = vector.broadcast %17 : vector<8x1xf32> to vector<8x128xf32>
    %19 = arith.mulf %16, %18 : vector<8x128xf32>
    %20 = arith.addf %14, %19 : vector<8x128xf32>
    %c0_5 = arith.constant 0 : index
    %c0_6 = arith.constant 0 : index
    %21 = vector.load %arg5[%c0_5, %c0_6] : memref<16x8xf32, #tpu.memory_space<vmem>>, vector<16x8xf32>
    %cst = arith.constant dense<0.000000e+00> : vector<16x128xf32>
    %22 = tpu.matmul %21, %20, %cst {dimension_numbers = #tpu.dot_dimension_numbers<[1], [0], [0], [1], [0, 0, 1, 1], [], []>} : vector<16x8xf32>, vector<8x128xf32>, vector<16x128xf32> -> vector<16x128xf32>
    %c0_7 = arith.constant 0 : index
    %c0_8 = arith.constant 0 : index
    %23 = vector.load %arg6[%c0_7, %c0_8] : memref<16x1xf32, #tpu.memory_space<vmem>>, vector<16x1xf32>
    %24 = vector.broadcast %23 : vector<16x1xf32> to vector<16x128xf32>
    %25 = arith.addf %22, %24 : vector<16x128xf32>
    %c0_9 = arith.constant 0 : index
    %c0_10 = arith.constant 0 : index
    %26 = vector.load %arg7[%c0_9, %c0_10] : memref<16x128xf32, #tpu.memory_space<vmem>>, vector<16x128xf32>
    tpu.vector_store %arg7[%c0_9, %c0_10], %25 {strides = array<i32>} : memref<16x128xf32, #tpu.memory_space<vmem>>, vector<16x128xf32>,
    return
  }
  func.func @transform_0(%arg0: i32, %arg1: i32) -> (i32, i32) {
    %c0_i32 = arith.constant 0 : i32
    return %arg0, %arg1 : i32, i32
  }
  func.func @transform_1(%arg0: i32, %arg1: i32) -> (i32, i32, i32) {
    %c0_i32 = arith.constant 0 : i32
    %c0_i32_0 = arith.constant 0 : i32
    %c0_i32_1 = arith.constant 0 : i32
    return %c0_i32, %arg0, %c0_i32_0 : i32, i32, i32
  }
  func.func @transform_2(%arg0: i32, %arg1: i32) -> (i32, i32) {
    %c0_i32 = arith.constant 0 : i32
    %c0_i32_0 = arith.constant 0 : i32
    %c0_i32_1 = arith.constant 0 : i32
    return %c0_i32, %c0_i32_0 : i32, i32
  }
  func.func @transform_3(%arg0: i32, %arg1: i32) -> (i32, i32) {
    %c0_i32 = arith.constant 0 : i32
    %c0_i32_0 = arith.constant 0 : i32
    %c0_i32_1 = arith.constant 0 : i32
    return %c0_i32, %c0_i32_0 : i32, i32
  }
  func.func @transform_4(%arg0: i32, %arg1: i32) -> (i32, i32) {
    %c0_i32 = arith.constant 0 : i32
    %c0_i32_0 = arith.constant 0 : i32
    %c0_i32_1 = arith.constant 0 : i32
    return %c0_i32, %c0_i32_0 : i32, i32
  }
  func.func @transform_5(%arg0: i32, %arg1: i32) -> (i32, i32) {
    %c0_i32 = arith.constant 0 : i32
    return %arg0, %arg1 : i32, i32
  }
}

</mosaic_0001>

<bundles_post_ra>
// kernel: tpu_custom_call.1
= control target key start
LH: loop header
LB: loop body
LE: loop exit
PB: predicated region body
PF: predicated region fallthrough
CT: control target
= control target key end

     0   :  { %10 = vsyncpa [#allocation3], 0  ;;  %s552_s0 = inlined_call_operand.hbm [shape: f32[8,130], index: 0, kind: input, shape index: {}]   ;;  %s553_s1 = inlined_call_operand.hbm [shape: f32[1,8,2], index: 1, kind: input, shape index: {}]   ;;  %s554_s2 = inlined_call_operand.hbm [shape: f32[8,3], index: 2, kind: input, shape index: {}]   ;;  %s555_s3 = inlined_call_operand.hbm [shape: f32[16,8], index: 3, kind: input, shape index: {}]   ;;  %s556_s4 = inlined_call_operand.hbm [shape: f32[16,1], index: 4, kind: input, shape index: {}]   ;;  %s557_s5 = inlined_call_operand.hbm [shape: f32[16,128], index: 5, kind: output, shape index: {}]  }
   0x1   :  { %11 = vsyncpa [#allocation6], 0 }
   0x2   :  { %12 = vsyncpa [#allocation9], 0 }
   0x3   :  { %13 = vsyncpa [#allocation4], 0  ;;  %s409_s18 = smov [#allocation5]   ;;  %s410_s20 = smov [#allocation8]  }
   0x4   :  { %s30_s19 = sshll.u32 %s409_s18, 4  ;;  %s49_s21 = sshll.u32 %s410_s20, 4  ;;  %s31_s19 = int_to_ptr.vmem [resolvable:$true] %s30_s19  ;;  %s452_s21 = int_to_ptr.vmem [resolvable:$true] %s49_s21 }
   0x5   :  { %s269_s24 = scalar_lea.hbm %s553_s1, 128 }
   0x6   :  { %p270_p0 = scmp.ne.s32.totalorder %s553_s1, %s269_s24  ;;  %p273_p1 = scmp.lt.u32.totalorder %s269_s24, %s553_s1 }
   0x8   :  { %p275_p2 = pnand %p273_p1, %p270_p0 }
   0xa   :  { %278 = shalt.err (!%p275_p2)
}
   0xb   :  { %s279_s29 = scalar_lea.vmem %s31_s19, 128  ;;  %p284_p4 = scmp.lt.s32.totalorder %s31_s19, %s31_s19 }
   0xc   :  { %p280_p3 = scmp.ne.s32.totalorder %s31_s19, %s279_s29  ;;  %p285_p5 = scmp.lt.s32.totalorder %s279_s29, %s279_s29 }
   0xe   :  { %p286_p6 = por %p285_p5, %p284_p4 }
  0x10   :  { %p287_p7 = pnand %p286_p6, %p280_p3 }
  0x12   :  { %290 = shalt.err (!%p287_p7)
}
  0x13   :  { %33 = dma.hbm_to_vmem [thread:$0]  %s553_s1, 128, %s31_s19, [#allocation6]  }
  0x14   :  { %s291_s9 = scalar_lea.hbm %s555_s3, 256 }
  0x15   :  { %p292_p8 = scmp.ne.s32.totalorder %s555_s3, %s291_s9  ;;  %p295_p9 = scmp.lt.u32.totalorder %s291_s9, %s555_s3 }
  0x17   :  { %p297_p10 = pnand %p295_p9, %p292_p8 }
  0x19   :  { %300 = shalt.err (!%p297_p10)
}
  0x1a   :  { %s301_s14 = scalar_lea.vmem %s452_s21, 256  ;;  %p306_p12 = scmp.lt.s32.totalorder %s452_s21, %s452_s21 }
  0x1b   :  { %p302_p11 = scmp.ne.s32.totalorder %s452_s21, %s301_s14  ;;  %p307_p13 = scmp.lt.s32.totalorder %s301_s14, %s301_s14 }
  0x1d   :  { %p308_p0 = por %p307_p13, %p306_p12 }
  0x1f   :  { %p309_p1 = pnand %p308_p0, %p302_p11 }
  0x21   :  { %312 = shalt.err (!%p309_p1)
}
  0x22   :  { %s411_s1 = smov 128   ;;  %s412_s15 = smov 8  }
  0x23   :  { %55 = dma.hbm_to_vmem [thread:$0]  %s555_s3, 256, %s452_s21, [#allocation9], %s411_s1, %s411_s1, %s412_s15  }
  0x24   :  { %s413_s18 = smov [#allocation2]   ;;  %s414_s20 = smov [#allocation7]  }
  0x25   :  { %s20_s19 = sshll.u32 %s413_s18, 4  ;;  %s40_s22 = sshll.u32 %s414_s20, 4  ;;  %s21_s19 = int_to_ptr.vmem [resolvable:$true] %s20_s19  ;;  %s486_s22 = int_to_ptr.vmem [resolvable:$true] %s40_s22 }
  0x26   :  { %s313_s25 = scalar_lea.hbm %s552_s0, 128  ;;  %s315_s30 = scalar_lea.hbm %s552_s0, 256 }
  0x27   :  { %p314_p2 = scmp.ne.s32.totalorder %s552_s0, %s313_s25  ;;  %p316_p3 = scmp.lt.u32.totalorder %s315_s30, %s313_s25 }
  0x28   :  { %p317_p4 = scmp.lt.u32.totalorder %s313_s25, %s552_s0 }
  0x2a   :  { %p318_p5 = por %p317_p4, %p316_p3 }
  0x2c   :  { %p319_p6 = pnand %p318_p5, %p314_p2 }
  0x2e   :  { %322 = shalt.err (!%p319_p6)
}
  0x2f   :  { %s323_s6 = scalar_lea.vmem %s21_s19, 128  ;;  %p328_p8 = scmp.lt.s32.totalorder %s21_s19, %s21_s19 }
  0x30   :  { %p324_p7 = scmp.ne.s32.totalorder %s21_s19, %s323_s6  ;;  %p329_p9 = scmp.lt.s32.totalorder %s323_s6, %s323_s6 }
  0x32   :  { %p330_p10 = por %p329_p9, %p328_p8 }
  0x34   :  { %p331_p11 = pnand %p330_p10, %p324_p7 }
  0x36   :  { %334 = shalt.err (!%p331_p11)
}
  0x37   :  { %23 = dma.hbm_to_vmem [thread:$0]  %s552_s0, 128, %s21_s19, [#allocation3]  }
  0x38   :  { %s335_s11 = scalar_lea.hbm %s554_s2, 128 }
  0x39   :  { %p336_p12 = scmp.ne.s32.totalorder %s554_s2, %s335_s11  ;;  %p339_p13 = scmp.lt.u32.totalorder %s335_s11, %s554_s2 }
  0x3b   :  { %p341_p0 = pnand %p339_p13, %p336_p12 }
  0x3d   :  { %344 = shalt.err (!%p341_p0)
}
  0x3e   :  { %s345_s17 = scalar_lea.vmem %s486_s22, 128  ;;  %p350_p2 = scmp.lt.s32.totalorder %s486_s22, %s486_s22 }
  0x3f   :  { %p346_p1 = scmp.ne.s32.totalorder %s486_s22, %s345_s17  ;;  %p351_p3 = scmp.lt.s32.totalorder %s345_s17, %s345_s17 }
  0x41   :  { %p352_p4 = por %p351_p3, %p350_p2 }
  0x43   :  { %p353_p5 = pnand %p352_p4, %p346_p1 }
  0x45   :  { %356 = shalt.err (!%p353_p5)
}
  0x46   :  { %43 = dma.hbm_to_vmem [thread:$0]  %s554_s2, 128, %s486_s22, [#allocation6]  }
  0x47   :  { %s415_s19 = smov [#allocation10]   ;;  %s357_s25 = scalar_lea.hbm %s556_s4, 256 }
  0x48   :  { %s61_s20 = sshll.u32 %s415_s19, 4  ;;  %p358_p6 = scmp.ne.s32.totalorder %s556_s4, %s357_s25  ;;  %s62_s20 = int_to_ptr.vmem [resolvable:$true] %s61_s20 }
  0x49   :  { %p361_p7 = scmp.lt.u32.totalorder %s357_s25, %s556_s4 }
  0x4b   :  { %p363_p8 = pnand %p361_p7, %p358_p6 }
  0x4d   :  { %366 = shalt.err (!%p363_p8)
}
  0x4e   :  { %s367_s30 = scalar_lea.vmem %s62_s20, 256  ;;  %p372_p10 = scmp.lt.s32.totalorder %s62_s20, %s62_s20 }
  0x4f   :  { %p368_p9 = scmp.ne.s32.totalorder %s62_s20, %s367_s30  ;;  %p373_p11 = scmp.lt.s32.totalorder %s367_s30, %s367_s30 }
  0x51   :  { %p374_p12 = por %p373_p11, %p372_p10 }
  0x53   :  { %p375_p13 = pnand %p374_p12, %p368_p9 }
  0x55   :  { %378 = shalt.err (!%p375_p13)
}
  0x56   :  { %67 = dma.hbm_to_vmem [thread:$0]  %s556_s4, 256, %s62_s20, [#allocation9], %s411_s1, %s411_s1, %s412_s15  }
  0x57   :  { %401 = dma.done.wait [#allocation3], 128  }
  0x58   :  { %402 = vsyncadd [#allocation3], 4294967168 }
  0x59   :  { %403 = dma.done.wait [#allocation6], 256  }
  0x5a   :  { %404 = vsyncadd [#allocation6], 4294967040 }
  0x5b   :  { %405 = dma.done.wait [#allocation9], 512  }
  0x5c   :  { %406 = vsyncadd [#allocation9], 4294966784  ;;  %v416_v0 = vmov 2   ;;  %v417_v1 = vmov 0   ;;  %v84_v2 = vld [vmem:[#allocation7] sm:$0xff]  ;;  %v83_v3 = vld [vmem:[#allocation2] sm:$0xff] }
  0x5d   :  { %266 = vset.pattern.permute.xlu1 %v416_v0  ;;  %264 = vset.pattern.permute.xlu0 %v417_v1  ;;  %v418_v4 = vmov 1   ;;  %s419_s3 = smov 127   ;;  %v93_v5 = vld [vmem:[#allocation5] sm:$0xff]  ;;  %s420_s4 = smov 126   ;;  %v124_v6 = vld [vmem:[#allocation8] sm:$0xff]  ;;  %vm138_vm0 = vcmask 64512  }
  0x5e   :  { %119 = vperm.xlu1 %266, %v84_v2   ;;  %87 = vperm.xlu0 %264, %v84_v2   ;;  %v127_v7 = vld [vmem:[#allocation10 + $0x8] sm:$0xff]  ;;  %v126_v8 = vld [vmem:[#allocation10] sm:$0xff]  ;;  %vm102_vm1 = vcmask 1039360   ;;  %vm116_vm2 = vcmask 1031168   ;;  %v125_v23 = vld [vmem:[#allocation8 + $0x8] sm:$0xff]  ;;  %s421_s21 = smov [#allocation11]  }
  0x5f   :  { %248 = vmatprep.mubr.msk.f32.mxu0 %vm138_vm0, %v124_v6  ;;  %s227_s6 = sshll.u32 %s421_s21, 4  ;;  %s228_s6 = int_to_ptr.vmem [resolvable:$true] %s227_s6 }
  0x60   :  { %s379_s7 = scalar_lea.vmem %s228_s6, 256  ;;  %p384_p1 = scmp.lt.s32.totalorder %s228_s6, %s228_s6 }
  0x61   :  { %p380_p0 = scmp.ne.s32.totalorder %s228_s6, %s379_s7  ;;  %p385_p2 = scmp.lt.s32.totalorder %s379_s7, %s379_s7 }
  0x62   :  { %265 = vset.pattern.permute.xlu0 %v418_v4  ;;  %95 = vrot.lane.b32.xlu1 %v83_v3, %s419_s3 }
  0x63   :  { %105 = vperm.xlu0 %265, %v84_v2   ;;  %268 = vset.pattern.permute.xlu1 %v417_v1  ;;  %p386_p3 = por %p385_p2, %p384_p1 }
  0x65   :  { %p387_p4 = pnand %p386_p3, %p380_p0 }
  0x66   :  { %99 = vrot.lane.b32.xlu1 %v93_v5, %s419_s3 }
  0x67   :  { %110 = vrot.lane.b32.xlu0 %v83_v3, %s420_s4 }
  0x68   :  { %267 = vset.pattern.permute.xlu0 %v417_v1 }
  0x6a   :  { %113 = vrot.lane.b32.xlu1 %v93_v5, %s420_s4 }
  0x6b   :  { %130 = vperm.xlu0 %267, %v126_v8  }
  0x6e   :  { %135 = vperm.xlu1 %268, %v127_v7  }
  0xdd   :  { %v120_v9 = vpop.permute.xlu1 %119  ;;  %v88_v10 = vpop.permute.xlu0 %87 }
  0xde   :  { %v90_v17 = vmul.f32 %v88_v10, %v83_v3 }
  0xe1   :  { %v96_v11 = vpop.permute.xlu1 %95 }
  0xe2   :  { %v106_v12 = vpop.permute.xlu0 %105 }
  0xe5   :  { %v100_v13 = vpop.permute.xlu1 %99 }
  0xe6   :  { %v103_v14 = vsel %vm102_vm1, %v96_v11, %v100_v13  ;;  %v111_v16 = vpop.permute.xlu0 %110 }
  0xe7   :  { %v108_v15 = vmul.f32 %v106_v12, %v103_v14 }
  0xe9   :  { %v114_v18 = vpop.permute.xlu1 %113  ;;  %v109_v21 = vadd.f32 %v108_v15, %v90_v17 }
  0xea   :  { %v117_v19 = vsel %vm116_vm2, %v111_v16, %v114_v18  ;;  %v131_v25 = vpop.permute.xlu0 %130 }
  0xeb   :  { %v122_v20 = vmul.f32 %v120_v9, %v117_v19 }
  0xed   :  { %v123_v22 = vadd.f32 %v122_v20, %v109_v21  ;;  %v136_v24 = vpop.permute.xlu1 %135 }
  0xef   :  { %246 = vmatprep.subr.mxu0 %v123_v22 }
  0xf0   :  { %247 = vmatpush3.msra.mxu0 %v123_v22 }
  0xf1   :  { %249 = vmatmul.mubr.msk.f32.vlgmr.msra.gmra.mrb[0].mxu0 %vm138_vm0, %v125_v23 }
 0x1c4   :  { %v250_v26 = vpop.f32.mrb[0].mxu0 }
 0x1c5   :  { %v217_v27 = vadd.f32 %v250_v26, %v136_v24  ;;  %v211_v28 = vpop.f32.mrb[1].mxu0 }
 0x1c6   :  { %v212_v29 = vadd.f32 %v211_v28, %v131_v25 }
 0x1c7   :  { %221 = vst [vmem:[#allocation11 + $0x8] sm:$0xff] %v217_v27 }
 0x1c8   :  { %220 = vst [vmem:[#allocation11] sm:$0xff] %v212_v29 }
 0x1c9   :  { %390 = shalt.err (!%p387_p4)
}
 0x1ca   :  { %s391_s10 = scalar_lea.hbm %s557_s5, 256 }
 0x1cb   :  { %p392_p5 = scmp.ne.s32.totalorder %s557_s5, %s391_s10  ;;  %p395_p6 = scmp.lt.u32.totalorder %s391_s10, %s557_s5 }
 0x1cd   :  { %p397_p7 = pnand %p395_p6, %p392_p5 }
 0x1cf   :  { %400 = shalt.err (!%p397_p7)
}
 0x1d0   :  { %233 = dma.vmem_to_hbm [thread:$0]  %s228_s6, 256, %s557_s5, [#allocation4], %s411_s1, %s411_s1, %s412_s15  }
 0x1d1   :  { %407 = dma.done.wait [#allocation4], 256  }
 0x1d2   :  { %408 = vsyncadd [#allocation4], 4294967040 }
 0x1d3   :  { %237 = vsyncpa [#allocation3], 1 }
 0x1d4   :  { %238 = vsyncpa [#allocation6], 1 }
 0x1d5   :  { %239 = vsyncpa [#allocation9], 1 }
 0x1d6   :  { %240 = vsyncpa [#allocation4], 1 }

</bundles_post_ra>
